<compile_context>
chip_gen: v7x
topology: tpu7x:2x2x1
jax: 0.10.0
libtpu: 0.0.40
codegen_flags: <defaults>
</compile_context>

<pallas_src>
import functools

import jax
import jax.numpy as jnp
import numpy as np
from jax.experimental import pallas as pl
from jax.experimental.pallas import tpu as pltpu

THR = 0.0  # module default threshold


def _accuracy_kernel(pred_ref, tgt_ref, out_ref, *, topk, n_total, tile_n, thr):
    i = pl.program_id(0)

    pred = pred_ref[...]                      # (T, C) native dtype (f32 / bf16)
    tgt = tgt_ref[...]                        # (T, 1) int32
    t, c = pred.shape

    # One-hot mask of the target class per row (exactly one True per valid
    # row; garbage rows of the ragged last block are gated out below).
    col = jax.lax.broadcasted_iota(jnp.int32, (t, c), 1)
    tmask = col == tgt                                                    # (T, C)

    # Target-class score (exact even in bf16: single non-zero per row).
    tscore = jnp.sum(jnp.where(tmask, pred, 0), axis=1, keepdims=True)    # (T, 1)

    # Rank = number of strictly larger scores in the row (counted in f32).
    rank = jnp.sum((pred > tscore).astype(jnp.float32),
                   axis=1, keepdims=True)                                 # (T, 1)

    # Threshold gate + global-row validity gate.  The validity gate masks the
    # ragged tail of the last block (no wrapper padding); it is kept for every
    # tile — 2 cheap lane-sparse ops — rather than guarded with pl.when.
    row = i * tile_n + jax.lax.broadcasted_iota(jnp.int32, (t, 1), 0)
    gate = jnp.logical_and(tscore > thr, row < n_total)                   # (T, 1) bool

    # k thresholds are Python scalar constants (clamped to C, as in the
    # reference).  Scalars are inlined — no captured constant arrays.
    counts = []
    for k in topk:
        kk = float(min(int(k), c))
        correct_k = jnp.logical_and(rank < kk, gate)                      # (T, 1) bool
        counts.append(
            jnp.sum(correct_k.astype(jnp.float32), axis=0, keepdims=True))  # (1, 1)

    out_ref[...] = jnp.concatenate(counts, axis=1).reshape(1, 1, len(topk))


@functools.lru_cache(maxsize=1)
def _vmem_capacity_bytes():
    try:
        return int(pltpu.get_tpu_info().vmem_capacity_bytes)
    except Exception:
        return 128 * 1024 * 1024  # v5e/v6e default if the query is unavailable


def _pick_tile_n(n, c, itemsize):
    """Byte-sized pred blocks: ~8 MiB on 128-MiB-VMEM parts, ~6 MiB on v7x."""
    capacity = _vmem_capacity_bytes()
    target_bytes = (8 * 1024 * 1024 if capacity >= 96 * 1024 * 1024
                    else 6 * 1024 * 1024)
    # Count the 128-lane-padded int32 target block in the per-row budget.
    bytes_per_row = c * itemsize + 128 * 4
    tile = max(8, (target_bytes // max(1, bytes_per_row)) // 8 * 8)
    n_pad8 = ((n + 7) // 8) * 8
    tile = min(tile, n_pad8)
    # Megacore (v7x): guarantee the "parallel" grid axis has >= 2 tiles when
    # the byte-sized block would otherwise swallow the whole batch.
    if tile >= n and n > 8:
        tile = max(8, (((n + 1) // 2 + 7) // 8) * 8)
    return int(tile)


@functools.partial(jax.jit, static_argnames=("topk", "tile_n"))
def _accuracy_pallas(pred, target, topk, tile_n=None):
    n, c = pred.shape
    k = len(topk)
    itemsize = jnp.dtype(pred.dtype).itemsize

    if tile_n is None:
        tile_n = _pick_tile_n(n, c, itemsize)
    num_tiles = -(-n // tile_n)               # cdiv; ragged last block, no pad

    target2d = target.astype(jnp.int32).reshape(n, 1)

    kernel = functools.partial(
        _accuracy_kernel, topk=topk, n_total=n, tile_n=tile_n, thr=THR)

    cost = pl.CostEstimate(
        flops=3 * n * c,
        transcendentals=0,
        bytes_accessed=n * c * itemsize + n * 4 + num_tiles * k * 4,
    )

    capacity = _vmem_capacity_bytes()
    # 64 MiB scoped limit on 128-MiB parts (v5e/v6e), ~48 MiB on 64-MiB v7x.
    vmem_limit = int(min(64 * 1024 * 1024, (capacity * 3) // 4))

    partial_counts = pl.pallas_call(
        kernel,
        out_shape=jax.ShapeDtypeStruct((num_tiles, 1, k), jnp.float32),
        grid_spec=pl.GridSpec(
            grid=(num_tiles,),
            in_specs=[
                pl.BlockSpec((tile_n, c), lambda i: (i, 0)),
                pl.BlockSpec((tile_n, 1), lambda i: (i, 0)),
            ],
            out_specs=pl.BlockSpec((1, 1, k), lambda i: (i, 0, 0)),
        ),
        compiler_params=pltpu.CompilerParams(
            dimension_semantics=("parallel",),
            vmem_limit_bytes=vmem_limit,
        ),
        cost_estimate=cost,
    )(pred, target2d)

    counts = jnp.sum(partial_counts, axis=(0, 1))           # (K,) f32
    return counts * (100.0 / n)                             # scale with GLOBAL N


class Accuracy:
    """JAX/Pallas counterpart of mmcls Accuracy module (thrs=0.0 default)."""

    def __init__(self, topk=(1,)):
        assert isinstance(topk, (int, tuple))
        if isinstance(topk, int):
            topk = (topk,)
        self.topk = tuple(int(k) for k in topk)

    def __call__(self, pred, target, tile_n=None):
        out = _accuracy_pallas(pred, target, self.topk, tile_n=tile_n)    # (K,)
        # Match torch output: list of tensors, each of shape (1,).
        return [out[i:i + 1] for i in range(len(self.topk))]


def _reference_accuracy(pred, target, topk):
    """Pure numpy reference mirroring accuracy_torch semantics (thrs=0.0)."""
    pred = np.asarray(pred, dtype=np.float32)
    target = np.asarray(target)
    n = pred.shape[0]
    res = []
    maxk = min(max(topk), pred.shape[1])
    order = np.argsort(-pred, axis=1, kind="stable")[:, :maxk]           # (N, maxk)
    scores = np.take_along_axis(pred, order, axis=1)                     # (N, maxk)
    correct = (order == target[:, None])                                 # (N, maxk)
    for k in topk:
        ok = correct[:, :k] & (scores[:, :k] > THR)
        res.append(np.array([ok.sum() * 100.0 / n], dtype=np.float32))
    return res


if __name__ == "__main__":
    key = jax.random.PRNGKey(0)

    # --- Test 1: small shapes, single tile, f32 ---
    kp, kt, key = jax.random.split(key, 3)
    N, C = 8, 16
    pred = jax.random.normal(kp, (N, C), dtype=jnp.float32)
    target = jax.random.randint(kt, (N,), 0, C, dtype=jnp.int32)

    module = Accuracy(topk=(1, 5))
    out = [jax.block_until_ready(o) for o in module(pred, target)]
    ref = _reference_accuracy(np.asarray(pred), np.asarray(target), (1, 5))
    for got, want in zip(out, ref):
        np.testing.assert_allclose(np.asarray(got), want, rtol=1e-6, atol=1e-6)

    # --- Test 2: multi-tile + ragged last block masking (forced small tile) ---
    kp, kt, key = jax.random.split(key, 3)
    N2, C2 = 300, 130
    pred2 = jax.random.normal(kp, (N2, C2), dtype=jnp.float32)
    target2 = jax.random.randint(kt, (N2,), 0, C2, dtype=jnp.int32)

    out2 = [jax.block_until_ready(o) for o in module(pred2, target2, tile_n=64)]
    ref2 = _reference_accuracy(np.asarray(pred2), np.asarray(target2), (1, 5))
    for got, want in zip(out2, ref2):
        np.testing.assert_allclose(np.asarray(got), want, rtol=1e-6, atol=1e-6)

    # --- Test 3: bf16 logits stay bf16 in-kernel (no upcast copy) ---
    pred3 = pred2.astype(jnp.bfloat16)
    out3 = [jax.block_until_ready(o) for o in module(pred3, target2, tile_n=64)]
    ref3 = _reference_accuracy(
        np.asarray(pred3.astype(jnp.float32)), np.asarray(target2), (1, 5))
    for got, want in zip(out3, ref3):
        np.testing.assert_allclose(np.asarray(got), want, rtol=1e-6, atol=1e-6)

    print("KERNEL_OK")
</pallas_src>

<mosaic_0001>
module attributes {stable_mosaic.version = 11 : i64} {
  func.func @_accuracy_kernel(%arg0: i32, %arg1: memref<8x16xf32, #tpu.memory_space<vmem>>, %arg2: memref<8x1xi32, #tpu.memory_space<vmem>>, %arg3: memref<1x1x2xf32, #tpu.memory_space<vmem>>) attributes {dimension_semantics = [#tpu.dimension_semantics<parallel>], iteration_bounds = array<i64: 1>, scalar_prefetch = 0 : i64, scratch_operands = 0 : i64, tpu.core_type = #tpu.core_type<tc>, window_params = [{transform_indices = @transform_0, window_bounds = array<i64: 8, 16>}, {transform_indices = @transform_1, window_bounds = array<i64: 8, 1>}, {transform_indices = @transform_2, window_bounds = array<i64: 1, 1, 2>}]} {
    %c0 = arith.constant 0 : index
    %c0_0 = arith.constant 0 : index
    %0 = vector.load %arg1[%c0, %c0_0] : memref<8x16xf32, #tpu.memory_space<vmem>>, vector<8x16xf32>
    %c0_1 = arith.constant 0 : index
    %c0_2 = arith.constant 0 : index
    %1 = vector.load %arg2[%c0_1, %c0_2] : memref<8x1xi32, #tpu.memory_space<vmem>>, vector<8x1xi32>
    %2 = tpu.iota {dimensions = array<i32: 1>} : vector<8x16xi32>
    %3 = vector.broadcast %1 : vector<8x1xi32> to vector<8x16xi32>
    %4 = arith.cmpi eq, %2, %3 : vector<8x16xi32>
    %c0_i32 = arith.constant 0 : i32
    %5 = arith.sitofp %c0_i32 : i32 to f32
    %6 = vector.broadcast %5 : f32 to vector<8x16xf32>
    %7 = arith.select %4, %0, %6 : vector<8x16xi1>, vector<8x16xf32>
    %cst = arith.constant dense<0.000000e+00> : vector<8xf32>
    %8 = vector.multi_reduction <add>, %7, %cst [1] : vector<8x16xf32> to vector<8xf32>
    %9 = vector.shape_cast %8 : vector<8xf32> to vector<8x1xf32>
    %10 = vector.broadcast %9 : vector<8x1xf32> to vector<8x16xf32>
    %11 = arith.cmpf ogt, %0, %10 : vector<8x16xf32>
    %12 = arith.extui %11 : vector<8x16xi1> to vector<8x16xi32>
    %13 = arith.sitofp %12 : vector<8x16xi32> to vector<8x16xf32>
    %cst_3 = arith.constant dense<0.000000e+00> : vector<8xf32>
    %14 = vector.multi_reduction <add>, %13, %cst_3 [1] : vector<8x16xf32> to vector<8xf32>
    %15 = vector.shape_cast %14 : vector<8xf32> to vector<8x1xf32>
    %c8_i32 = arith.constant 8 : i32
    %16 = arith.muli %arg0, %c8_i32 : i32
    %17 = tpu.iota {dimensions = array<i32: 0>} : vector<8x1xi32>
    %18 = vector.broadcast %16 : i32 to vector<8x1xi32>
    %19 = arith.addi %18, %17 : vector<8x1xi32>
    %cst_4 = arith.constant 0.000000e+00 : f32
    %20 = vector.broadcast %cst_4 : f32 to vector<8x1xf32>
    %21 = arith.cmpf ogt, %9, %20 : vector<8x1xf32>
    %c8_i32_5 = arith.constant 8 : i32
    %22 = vector.broadcast %c8_i32_5 : i32 to vector<8x1xi32>
    %23 = arith.cmpi slt, %19, %22 : vector<8x1xi32>
    %24 = arith.andi %21, %23 : vector<8x1xi1>
    %cst_6 = arith.constant 1.000000e+00 : f32
    %25 = vector.broadcast %cst_6 : f32 to vector<8x1xf32>
    %26 = arith.cmpf olt, %15, %25 : vector<8x1xf32>
    %27 = arith.andi %26, %24 : vector<8x1xi1>
    %28 = arith.extui %27 : vector<8x1xi1> to vector<8x1xi32>
    %29 = arith.sitofp %28 : vector<8x1xi32> to vector<8x1xf32>
    %cst_7 = arith.constant dense<0.000000e+00> : vector<1xf32>
    %30 = vector.multi_reduction <add>, %29, %cst_7 [0] : vector<8x1xf32> to vector<1xf32>
    %31 = vector.shape_cast %30 : vector<1xf32> to vector<1x1xf32>
    %cst_8 = arith.constant 5.000000e+00 : f32
    %32 = vector.broadcast %cst_8 : f32 to vector<8x1xf32>
    %33 = arith.cmpf olt, %15, %32 : vector<8x1xf32>
    %34 = arith.andi %33, %24 : vector<8x1xi1>
    %35 = arith.extui %34 : vector<8x1xi1> to vector<8x1xi32>
    %36 = arith.sitofp %35 : vector<8x1xi32> to vector<8x1xf32>
    %cst_9 = arith.constant dense<0.000000e+00> : vector<1xf32>
    %37 = vector.multi_reduction <add>, %36, %cst_9 [0] : vector<8x1xf32> to vector<1xf32>
    %38 = vector.shape_cast %37 : vector<1xf32> to vector<1x1xf32>
    %39 = tpu.concatenate %31, %38 in 1 : vector<1x1xf32>, vector<1x1xf32> -> vector<1x2xf32>
    %40 = vector.shape_cast %39 : vector<1x2xf32> to vector<1x1x2xf32>
    %c0_10 = arith.constant 0 : index
    %c0_11 = arith.constant 0 : index
    %c0_12 = arith.constant 0 : index
    %41 = vector.load %arg3[%c0_10, %c0_11, %c0_12] : memref<1x1x2xf32, #tpu.memory_space<vmem>>, vector<1x1x2xf32>
    tpu.vector_store %arg3[%c0_10, %c0_11, %c0_12], %40 {strides = array<i32>} : memref<1x1x2xf32, #tpu.memory_space<vmem>>, vector<1x1x2xf32>,
    return
  }
  func.func @transform_0(%arg0: i32) -> (i32, i32) {
    %c0_i32 = arith.constant 0 : i32
    %c0_i32_0 = arith.constant 0 : i32
    return %arg0, %c0_i32 : i32, i32
  }
  func.func @transform_1(%arg0: i32) -> (i32, i32) {
    %c0_i32 = arith.constant 0 : i32
    %c0_i32_0 = arith.constant 0 : i32
    return %arg0, %c0_i32 : i32, i32
  }
  func.func @transform_2(%arg0: i32) -> (i32, i32, i32) {
    %c0_i32 = arith.constant 0 : i32
    %c0_i32_0 = arith.constant 0 : i32
    %c0_i32_1 = arith.constant 0 : i32
    return %arg0, %c0_i32, %c0_i32_0 : i32, i32, i32
  }
}

</mosaic_0001>

<bundles_post_ra>
// kernel: _accuracy_pallas.1
= control target key start
LH: loop header
LB: loop body
LE: loop exit
PB: predicated region body
PF: predicated region fallthrough
CT: control target
= control target key end

     0   :  { %7 = vsyncpa [#allocation3], 0  ;;  %s240_s0 = inlined_call_operand.hbm [shape: f32[8,16], index: 0, kind: input, shape index: {}]   ;;  %s241_s1 = inlined_call_operand.hbm [shape: s32[8,1], index: 1, kind: input, shape index: {}]   ;;  %s242_s2 = inlined_call_operand.hbm [shape: f32[1,1,2], index: 2, kind: output, shape index: {}]  }
   0x1   :  { %8 = vsyncpa [#allocation6], 0 }
   0x2   :  { %9 = vsyncpa [#allocation4], 0  ;;  %s184_s9 = smov [#allocation2]   ;;  %s185_s11 = smov [#allocation5]  }
   0x3   :  { %s16_s10 = sshll.u32 %s184_s9, 4  ;;  %s26_s12 = sshll.u32 %s185_s11, 4  ;;  %s17_s10 = int_to_ptr.vmem [resolvable:$true] %s16_s10  ;;  %s27_s12 = int_to_ptr.vmem [resolvable:$true] %s26_s12 }
   0x4   :  { %s112_s15 = scalar_lea.hbm %s240_s0, 128 }
   0x5   :  { %p113_p0 = scmp.ne.s32.totalorder %s240_s0, %s112_s15  ;;  %p116_p1 = scmp.lt.u32.totalorder %s112_s15, %s240_s0 }
   0x7   :  { %p118_p2 = pnand %p116_p1, %p113_p0 }
   0x9   :  { %121 = shalt.err (!%p118_p2)
}
   0xa   :  { %s122_s20 = scalar_lea.vmem %s17_s10, 128  ;;  %p127_p4 = scmp.lt.s32.totalorder %s17_s10, %s17_s10 }
   0xb   :  { %p123_p3 = scmp.ne.s32.totalorder %s17_s10, %s122_s20  ;;  %p128_p5 = scmp.lt.s32.totalorder %s122_s20, %s122_s20 }
   0xd   :  { %p129_p6 = por %p128_p5, %p127_p4 }
   0xf   :  { %p130_p7 = pnand %p129_p6, %p123_p3 }
  0x11   :  { %133 = shalt.err (!%p130_p7)
}
  0x12   :  { %19 = dma.hbm_to_vmem [thread:$0]  %s240_s0, 128, %s17_s10, [#allocation3]  }
  0x13   :  { %s134_s25 = scalar_lea.hbm %s241_s1, 128 }
  0x14   :  { %p135_p8 = scmp.ne.s32.totalorder %s241_s1, %s134_s25  ;;  %p138_p9 = scmp.lt.u32.totalorder %s134_s25, %s241_s1 }
  0x16   :  { %p140_p10 = pnand %p138_p9, %p135_p8 }
  0x18   :  { %143 = shalt.err (!%p140_p10)
}
  0x19   :  { %s144_s30 = scalar_lea.vmem %s27_s12, 128  ;;  %p149_p12 = scmp.lt.s32.totalorder %s27_s12, %s27_s12 }
  0x1a   :  { %p145_p11 = scmp.ne.s32.totalorder %s27_s12, %s144_s30  ;;  %p150_p13 = scmp.lt.s32.totalorder %s144_s30, %s144_s30 }
  0x1c   :  { %p151_p0 = por %p150_p13, %p149_p12 }
  0x1e   :  { %p152_p1 = pnand %p151_p0, %p145_p11 }
  0x20   :  { %155 = shalt.err (!%p152_p1)
}
  0x21   :  { %29 = dma.hbm_to_vmem [thread:$0]  %s241_s1, 128, %s27_s12, [#allocation6]  }
  0x22   :  { %178 = dma.done.wait [#allocation3], 128  }
  0x23   :  { %179 = vsyncadd [#allocation3], 4294967168 }
  0x24   :  { %180 = dma.done.wait [#allocation6], 128  }
  0x25   :  { %181 = vsyncadd [#allocation6], 4294967168  ;;  %v186_v0 = vmov 0   ;;  %v37_v1 = vld [vmem:[#allocation5] sm:$0xff]  ;;  %v38_v2 = vlaneseq  ;;  %v36_v4 = vld [vmem:[#allocation2] sm:$0xff]  ;;  %vm45_vm0 = vcmask 130048  }
  0x26   :  { %111 = vset.pattern.permute.xlu0 %v186_v0  ;;  %v187_v9 = vmov 0.0   ;;  %s188_s1 = smov [#allocation7]   ;;  %vm83_vm8 = vcmask 7168   ;;  %vm85_vm9 = vcmask 8192  }
  0x27   :  { %41 = vperm.xlu0 %111, %v37_v1   ;;  %v39_v3 = vand.u32 127, %v38_v2  ;;  %s93_s4 = sshll.u32 %s188_s1, 4  ;;  %s94_s4 = int_to_ptr.vmem [resolvable:$true] %s93_s4 }
  0x28   :  { %s156_s5 = scalar_lea.vmem %s94_s4, 16  ;;  %s160_s6 = scalar_lea.vmem %s94_s4, 32 }
  0x29   :  { %p157_p2 = scmp.ne.s32.totalorder %s94_s4, %s156_s5  ;;  %p161_p3 = scmp.lt.s32.totalorder %s94_s4, %s94_s4 }
  0x2a   :  { %p162_p4 = scmp.lt.s32.totalorder %s160_s6, %s156_s5 }
  0x2c   :  { %p163_p5 = por %p162_p4, %p161_p3 }
  0x2e   :  { %p164_p6 = pnand %p163_p5, %p157_p2 }
  0xa6   :  { %v42_v5 = vpop.permute.xlu0 %41 }
  0xa7   :  { %vm43_vm1 = vcmp.eq.s32.totalorder %v39_v3, %v42_v5 }
  0xa8   :  { %v44_v6 = vsel %vm43_vm1, %v36_v4, 0.0 }
  0xa9   :  { %v46_v7 = vsel %vm45_vm0, %v44_v6, 0.0 }
  0xaa   :  { %47 = vadd.xlane.f32.xlu0 %v46_v7 }
 0x137   :  { %v48_v8 = vpop.xlane.xlu0 %47 }
 0x138   :  { %vm49_vm2 = vcmp.gt.f32.partialorder %v36_v4, %v48_v8  ;;  %vm60_vm3 = vcmp.gt.f32.partialorder %v48_v8, 0.0 }
 0x139   :  { %v103_v10 = vsel %vm49_vm2, 1.0, %v187_v9 }
 0x13a   :  { %v52_v11 = vsel %vm45_vm0, %v103_v10, 0.0 }
 0x13b   :  { %53 = vadd.xlane.f32.xlu1 %v52_v11 }
 0x1c8   :  { %v54_v12 = vpop.xlane.xlu1 %53 }
 0x1c9   :  { %vm63_vm4 = vcmp.lt.f32.partialorder %v54_v12, 1.0  ;;  %vm73_vm5 = vcmp.lt.f32.partialorder %v54_v12, 5.0 }
 0x1ca   :  { %vm64_vm6 = vmand %vm63_vm4, %vm60_vm3 }
 0x1cb   :  { %v104_v13 = vsel %vm64_vm6, 1.0, %v187_v9  ;;  %vm74_vm7 = vmand %vm73_vm5, %vm60_vm3 }
 0x1cc   :  { %v67_v14 = vrot.slane %v104_v13, 4  ;;  %v105_v15 = vsel %vm74_vm7, 1.0, %v187_v9 }
 0x1cd   :  { %v77_v16 = vrot.slane %v105_v15, 4 }
 0x1ce   :  { %v68_v17 = vadd.f32 %v104_v13, %v67_v14 }
 0x1cf   :  { %v78_v18 = vadd.f32 %v105_v15, %v77_v16 }
 0x1d0   :  { %v69_v19 = vrot.slane %v68_v17, 2 }
 0x1d1   :  { %v79_v20 = vrot.slane %v78_v18, 2 }
 0x1d2   :  { %v70_v21 = vadd.f32 %v69_v19, %v68_v17 }
 0x1d3   :  { %v80_v22 = vadd.f32 %v79_v20, %v78_v18 }
 0x1d4   :  { %v71_v23 = vrot.slane %v70_v21, 1 }
 0x1d5   :  { %v81_v24 = vrot.slane %v80_v22, 1 }
 0x1d6   :  { %v72_v25 = vadd.f32 %v71_v23, %v70_v21 }
 0x1d7   :  { %v82_v26 = vadd.f32 %v81_v24, %v80_v22 }
 0x1d9   :  { %v84_v27 = vsel %vm83_vm8, %v72_v25, %v82_v26 }
 0x1da   :  { %86 = vst.msk [vmem:[#allocation7] sm:$0x1] %vm85_vm9, %v84_v27 }
 0x1db   :  { %167 = shalt.err (!%p164_p6)
}
 0x1dc   :  { %s168_s9 = scalar_lea.hbm %s242_s2, 16 }
 0x1dd   :  { %p169_p7 = scmp.ne.s32.totalorder %s242_s2, %s168_s9  ;;  %p172_p8 = scmp.lt.u32.totalorder %s168_s9, %s242_s2 }
 0x1df   :  { %p174_p9 = pnand %p172_p8, %p169_p7 }
 0x1e1   :  { %177 = shalt.err (!%p174_p9)
}
 0x1e2   :  { %96 = dma.vmem_to_hbm [thread:$0]  %s94_s4, 16, %s242_s2, [#allocation4]  }
 0x1e3   :  { %182 = dma.done.wait [#allocation4], 16  }
 0x1e4   :  { %183 = vsyncadd [#allocation4], 4294967280 }
 0x1e5   :  { %100 = vsyncpa [#allocation3], 1 }
 0x1e6   :  { %101 = vsyncpa [#allocation6], 1 }
 0x1e7   :  { %102 = vsyncpa [#allocation4], 1 }

</bundles_post_ra>
